<compile_context>
chip_gen: v7x
topology: tpu7x:2x2x1
jax: 0.10.0
libtpu: 0.0.40
codegen_flags: <defaults>
</compile_context>

<pallas_src>
import jax
import jax.numpy as jnp
import numpy as np
from jax.experimental import pallas as pl
from jax.experimental.pallas import tpu as pltpu


# ----------------------------- Pallas kernel -------------------------------

def skip_kernel(x1_ref, x2_ref, w1_ref, w2_ref, b_ref, o_ref):
    """Fused concat + 1x1 conv for the whole (lane-folded) batch.

    x1_ref: (d1, L)      earlier input, channels x (batch*pixels), lane-dense
    x2_ref: (d2, L)      later input
    w1_ref: (C_out, d1)  conv-weight columns acting on in1 channels
    w2_ref: (C_out, d2)  conv-weight columns acting on in2 channels
    b_ref : (C_out, 1)   conv bias
    o_ref : (C_out, L)   output (L is a multiple of 128)
    """
    acc = jnp.dot(w1_ref[...], x1_ref[...], preferred_element_type=jnp.float32)
    acc = acc + jnp.dot(w2_ref[...], x2_ref[...], preferred_element_type=jnp.float32)
    o_ref[...] = (acc + b_ref[...]).astype(o_ref.dtype)


# ------------------------------- wrapper ------------------------------------

def skip_connection_forward(in1, in2, w, b, out_features):
    """in1: (N, d1, H, W), in2: (N, d2, H, W), w: (C_out, d1+d2), b: (C_out,)."""
    N, d1, H, W = in1.shape
    _, d2, _, _ = in2.shape
    P = H * W
    L = N * P
    C_out = out_features
    out_dtype = in1.dtype

    # Fold the batch into the lane axis: (N, d, H, W) -> (d, N*P).
    x1 = jnp.transpose(in1.reshape(N, d1, P), (1, 0, 2)).reshape(d1, L)
    x2 = jnp.transpose(in2.reshape(N, d2, P), (1, 0, 2)).reshape(d2, L)

    # Guard the lane-dense assumption: pad the fused lane axis up to a multiple
    # of 128 so the output store stays fully unmasked; crop after the kernel.
    L_pad = ((L + 127) // 128) * 128
    if L_pad != L:
        x1 = jnp.pad(x1, ((0, 0), (0, L_pad - L)))
        x2 = jnp.pad(x2, ((0, 0), (0, L_pad - L)))

    # Static weight split replaces the runtime concat of the activations.
    w2d = w.reshape(C_out, d1 + d2)
    w1 = w2d[:, :d1]
    w2 = w2d[:, d1:]
    b_col = b.reshape(C_out, 1).astype(jnp.float32)

    # Single fused grid step: whole batch in one shot, everything VMEM-resident.
    out_flat = pl.pallas_call(
        skip_kernel,
        grid=(1,),
        in_specs=[
            pl.BlockSpec((d1, L_pad), lambda i: (0, 0)),
            pl.BlockSpec((d2, L_pad), lambda i: (0, 0)),
            pl.BlockSpec((C_out, d1), lambda i: (0, 0)),
            pl.BlockSpec((C_out, d2), lambda i: (0, 0)),
            pl.BlockSpec((C_out, 1), lambda i: (0, 0)),
        ],
        out_specs=pl.BlockSpec((C_out, L_pad), lambda i: (0, 0)),
        out_shape=jax.ShapeDtypeStruct((C_out, L_pad), out_dtype),
    )(x1, x2, w1, w2, b_col)

    out_flat = out_flat[:, :L]                              # crop lane padding
    # (C_out, N*P) -> (N, C_out, H, W)
    return jnp.transpose(out_flat.reshape(C_out, N, P), (1, 0, 2)).reshape(N, C_out, H, W)


# --------------------------- parameters & reference -------------------------

def init_params(key, in_features, out_features):
    """nn.Conv2d(in_features, out_features, 1) with xavier_uniform weight, zero bias."""
    bound = float(np.sqrt(6.0 / (in_features + out_features)))
    w = jax.random.uniform(key, (out_features, in_features), jnp.float32, -bound, bound)
    b = jnp.zeros((out_features,), jnp.float32)
    return w, b


def ref_forward(in1, in2, w, b):
    """Pure-JAX reference reproducing the PyTorch SkipConnection exactly."""
    cat = jnp.concatenate([in1, in2], axis=1)               # (N, d1+d2, H, W)
    out = jnp.einsum('oc,ncij->noij', w, cat) + b[None, :, None, None]
    return out


# --------------------------------- main --------------------------------------

if __name__ == "__main__":
    N, d1, d2, m = 2, 4, 8, 16          # in1: N x d1 x m x m, in2: N x d2 x m x m
    out_features = 8

    key = jax.random.PRNGKey(0)
    k1, k2, kp = jax.random.split(key, 3)
    in1 = jax.random.normal(k1, (N, d1, m, m), jnp.float32)
    in2 = jax.random.normal(k2, (N, d2, m, m), jnp.float32)
    w, b = init_params(kp, d1 + d2, out_features)

    out = skip_connection_forward(in1, in2, w, b, out_features)
    out = jax.block_until_ready(out)

    ref = ref_forward(in1, in2, w, b)
    assert out.shape == (N, out_features, m, m)
    np.testing.assert_allclose(np.asarray(out), np.asarray(ref), rtol=1e-5, atol=1e-5)

    print("KERNEL_OK")
</pallas_src>

<mosaic_0001>
module attributes {stable_mosaic.version = 11 : i64} {
  func.func @skip_kernel(%arg0: i32, %arg1: memref<4x512xf32, #tpu.memory_space<vmem>>, %arg2: memref<8x512xf32, #tpu.memory_space<vmem>>, %arg3: memref<8x4xf32, #tpu.memory_space<vmem>>, %arg4: memref<8x8xf32, #tpu.memory_space<vmem>>, %arg5: memref<8x1xf32, #tpu.memory_space<vmem>>, %arg6: memref<8x512xf32, #tpu.memory_space<vmem>>) attributes {dimension_semantics = [#tpu.dimension_semantics<arbitrary>], iteration_bounds = array<i64: 1>, scalar_prefetch = 0 : i64, scratch_operands = 0 : i64, tpu.core_type = #tpu.core_type<tc>, window_params = [{pipeline_mode = #tpu.pipeline_mode<synchronous>, transform_indices = @transform_0, window_bounds = array<i64: 4, 512>}, {pipeline_mode = #tpu.pipeline_mode<synchronous>, transform_indices = @transform_1, window_bounds = array<i64: 8, 512>}, {pipeline_mode = #tpu.pipeline_mode<synchronous>, transform_indices = @transform_2, window_bounds = array<i64: 8, 4>}, {pipeline_mode = #tpu.pipeline_mode<synchronous>, transform_indices = @transform_3, window_bounds = array<i64: 8, 8>}, {pipeline_mode = #tpu.pipeline_mode<synchronous>, transform_indices = @transform_4, window_bounds = array<i64: 8, 1>}, {pipeline_mode = #tpu.pipeline_mode<synchronous>, transform_indices = @transform_5, window_bounds = array<i64: 8, 512>}]} {
    %c0 = arith.constant 0 : index
    %c0_0 = arith.constant 0 : index
    %0 = vector.load %arg3[%c0, %c0_0] : memref<8x4xf32, #tpu.memory_space<vmem>>, vector<8x4xf32>
    %c0_1 = arith.constant 0 : index
    %c0_2 = arith.constant 0 : index
    %1 = vector.load %arg1[%c0_1, %c0_2] : memref<4x512xf32, #tpu.memory_space<vmem>>, vector<4x512xf32>
    %cst = arith.constant dense<0.000000e+00> : vector<8x512xf32>
    %2 = tpu.matmul %0, %1, %cst {dimension_numbers = #tpu.dot_dimension_numbers<[1], [0], [0], [1], [0, 0, 1, 1], [], []>} : vector<8x4xf32>, vector<4x512xf32>, vector<8x512xf32> -> vector<8x512xf32>
    %c0_3 = arith.constant 0 : index
    %c0_4 = arith.constant 0 : index
    %3 = vector.load %arg4[%c0_3, %c0_4] : memref<8x8xf32, #tpu.memory_space<vmem>>, vector<8x8xf32>
    %c0_5 = arith.constant 0 : index
    %c0_6 = arith.constant 0 : index
    %4 = vector.load %arg2[%c0_5, %c0_6] : memref<8x512xf32, #tpu.memory_space<vmem>>, vector<8x512xf32>
    %cst_7 = arith.constant dense<0.000000e+00> : vector<8x512xf32>
    %5 = tpu.matmul %3, %4, %cst_7 {dimension_numbers = #tpu.dot_dimension_numbers<[1], [0], [0], [1], [0, 0, 1, 1], [], []>} : vector<8x8xf32>, vector<8x512xf32>, vector<8x512xf32> -> vector<8x512xf32>
    %6 = arith.addf %2, %5 : vector<8x512xf32>
    %c0_8 = arith.constant 0 : index
    %c0_9 = arith.constant 0 : index
    %7 = vector.load %arg5[%c0_8, %c0_9] : memref<8x1xf32, #tpu.memory_space<vmem>>, vector<8x1xf32>
    %8 = vector.broadcast %7 : vector<8x1xf32> to vector<8x512xf32>
    %9 = arith.addf %6, %8 : vector<8x512xf32>
    %c0_10 = arith.constant 0 : index
    %c0_11 = arith.constant 0 : index
    %10 = vector.load %arg6[%c0_10, %c0_11] : memref<8x512xf32, #tpu.memory_space<vmem>>, vector<8x512xf32>
    tpu.vector_store %arg6[%c0_10, %c0_11], %9 {strides = array<i32>} : memref<8x512xf32, #tpu.memory_space<vmem>>, vector<8x512xf32>,
    return
  }
  func.func @transform_0(%arg0: i32) -> (i32, i32) {
    %c0_i32 = arith.constant 0 : i32
    %c0_i32_0 = arith.constant 0 : i32
    %c0_i32_1 = arith.constant 0 : i32
    return %c0_i32, %c0_i32_0 : i32, i32
  }
  func.func @transform_1(%arg0: i32) -> (i32, i32) {
    %c0_i32 = arith.constant 0 : i32
    %c0_i32_0 = arith.constant 0 : i32
    %c0_i32_1 = arith.constant 0 : i32
    return %c0_i32, %c0_i32_0 : i32, i32
  }
  func.func @transform_2(%arg0: i32) -> (i32, i32) {
    %c0_i32 = arith.constant 0 : i32
    %c0_i32_0 = arith.constant 0 : i32
    %c0_i32_1 = arith.constant 0 : i32
    return %c0_i32, %c0_i32_0 : i32, i32
  }
  func.func @transform_3(%arg0: i32) -> (i32, i32) {
    %c0_i32 = arith.constant 0 : i32
    %c0_i32_0 = arith.constant 0 : i32
    %c0_i32_1 = arith.constant 0 : i32
    return %c0_i32, %c0_i32_0 : i32, i32
  }
  func.func @transform_4(%arg0: i32) -> (i32, i32) {
    %c0_i32 = arith.constant 0 : i32
    %c0_i32_0 = arith.constant 0 : i32
    %c0_i32_1 = arith.constant 0 : i32
    return %c0_i32, %c0_i32_0 : i32, i32
  }
  func.func @transform_5(%arg0: i32) -> (i32, i32) {
    %c0_i32 = arith.constant 0 : i32
    %c0_i32_0 = arith.constant 0 : i32
    %c0_i32_1 = arith.constant 0 : i32
    return %c0_i32, %c0_i32_0 : i32, i32
  }
}

</mosaic_0001>

<bundles_post_ra>
// kernel: tpu_custom_call.1
= control target key start
LH: loop header
LB: loop body
LE: loop exit
PB: predicated region body
PF: predicated region fallthrough
CT: control target
= control target key end

     0   :  { %10 = vsyncpa [#allocation3], 0  ;;  %s515_s0 = inlined_call_operand.vmem [shape: f32[4,512], index: 0, kind: input, shape index: {}]   ;;  %s516_s1 = inlined_call_operand.hbm [shape: f32[8,512], index: 1, kind: input, shape index: {}]   ;;  %s517_s2 = inlined_call_operand.vmem [shape: f32[8,4], index: 2, kind: input, shape index: {}]   ;;  %s518_s3 = inlined_call_operand.vmem [shape: f32[8,8], index: 3, kind: input, shape index: {}]   ;;  %s519_s4 = inlined_call_operand.vmem [shape: f32[8,1], index: 4, kind: input, shape index: {}]   ;;  %s520_s5 = inlined_call_operand.hbm [shape: f32[8,512], index: 5, kind: output, shape index: {}]  }
   0x1   :  { %11 = vsyncpa [#allocation4], 0  ;;  %s442_s18 = smov [#allocation2]   ;;  %s394_s22 = scalar_lea.hbm %s516_s1, 512 }
   0x2   :  { %s20_s19 = sshll.u32 %s442_s18, 4  ;;  %p395_p0 = scmp.ne.s32.totalorder %s516_s1, %s394_s22  ;;  %s21_s19 = int_to_ptr.vmem [resolvable:$true] %s20_s19 }
   0x3   :  { %p398_p1 = scmp.lt.u32.totalorder %s394_s22, %s516_s1 }
   0x5   :  { %p400_p2 = pnand %p398_p1, %p395_p0 }
   0x7   :  { %403 = shalt.err (!%p400_p2)
}
   0x8   :  { %s404_s27 = scalar_lea.vmem %s21_s19, 512  ;;  %p409_p4 = scmp.lt.s32.totalorder %s21_s19, %s21_s19 }
   0x9   :  { %p405_p3 = scmp.ne.s32.totalorder %s21_s19, %s404_s27  ;;  %p410_p5 = scmp.lt.s32.totalorder %s404_s27, %s404_s27 }
   0xb   :  { %p411_p6 = por %p410_p5, %p409_p4 }
   0xd   :  { %p412_p7 = pnand %p411_p6, %p405_p3 }
   0xf   :  { %415 = shalt.err (!%p412_p7)
}
  0x10   :  { %23 = dma.hbm_to_vmem [thread:$0]  %s516_s1, 512, %s21_s19, [#allocation3]  }
  0x11   :  { %438 = dma.done.wait [#allocation3], 512  }
  0x12   :  { %439 = vsyncadd [#allocation3], 4294966784  ;;  %v443_v0 = vmov 0.0   ;;  %v444_v1 = vmov 0   ;;  %v38_v2 = vld [vmem:[#allocation2 + $0x8] sm:$0xff]  ;;  %v40_v3 = vld [vmem:[#allocation2 + $0x18] sm:$0xff] }
  0x13   :  { %109 = vmatprep.mubr.f32.mxu0 %v443_v0  ;;  %180 = vmatprep.mubr.f32.mxu1 %v443_v0  ;;  %v37_v4 = vld [vmem:[#allocation2] sm:$0xff]  ;;  %vm41_vm0 = vcmask 64512   ;;  %v39_v5 = vld [vmem:[#allocation2 + $0x10] sm:$0xff]  ;;  %vm195_vm1 = vcmask 1043456   ;;  %v35_v9 = vld [vmem:[%s515_s0 + $0x8] sm:$0xff]  ;;  %vm191_vm2 = vcmask 31744  }
  0x14   :  { %391 = vset.pattern.permute.xlu0 %v444_v1  ;;  %45 = vmatprep.subr.mxu0 %v38_v2  ;;  %v36_v6 = vld [vmem:[%s518_s3] sm:$0xff]  ;;  %v190_v10 = vcombine.high %v35_v9, %v35_v9 }
  0x15   :  { %116 = vmatprep.subr.mxu1 %v40_v3  ;;  %v34_v7 = vld [vmem:[%s515_s0] sm:$0xff]  ;;  %46 = vmatpush1.msra.mxu0 %v37_v4  ;;  %s445_s0 = smov [#allocation5]  }
  0x16   :  { %117 = vmatpush1.msra.mxu1 %v39_v5  ;;  %v189_v8 = vcombine.high %v34_v7, %v34_v7  ;;  %375 = vmatmul.mubr.msk.f32.vlgmr.msra.gmra.mrb[0].mxu0 %vm41_vm0, %v36_v6  ;;  %v346_v11 = vld [vmem:[%s519_s4] sm:$0xff]  ;;  %s366_s13 = sshll.u32 %s445_s0, 4  ;;  %s367_s13 = int_to_ptr.vmem [resolvable:$true] %s366_s13 }
  0x17   :  { %376 = vmatmul.mubr.msk.f32.vlgmr.msra.gmra.mrb[0].mxu1 %vm41_vm0, %v36_v6  ;;  %268 = vmatprep.mubr.f32.mxu0 %v443_v0  ;;  %v33_v12 = vld [vmem:[%s517_s2] sm:$0xff]  ;;  %s416_s2 = scalar_lea.vmem %s367_s13, 512  ;;  %p421_p9 = scmp.lt.s32.totalorder %s367_s13, %s367_s13 }
  0x18   :  { %377 = vmatprep.subr.msk.mxu0 %vm195_vm1, %v189_v8  ;;  %380 = vmatprep.subr.msk.mxu1 %vm195_vm1, %v190_v10  ;;  %p417_p8 = scmp.ne.s32.totalorder %s367_s13, %s416_s2  ;;  %p422_p10 = scmp.lt.s32.totalorder %s416_s2, %s416_s2 }
  0x19   :  { %378 = vmatpush1.msk.msra.mxu0 %vm195_vm1, %v34_v7  ;;  %381 = vmatpush1.msk.msra.mxu1 %vm195_vm1, %v35_v9 }
  0x1a   :  { %339 = vmatprep.mubr.f32.mxu1 %v443_v0  ;;  %349 = vperm.xlu0 %391, %v346_v11   ;;  %p423_p11 = por %p422_p10, %p421_p9 }
  0x1c   :  { %p424_p12 = pnand %p423_p11, %p417_p8 }
  0x1e   :  { %379 = vmatmul.mubr.msk.f32.vlgmr.msra.gmra.mrb[0].mxu0 %vm191_vm2, %v33_v12 }
  0x1f   :  { %382 = vmatmul.mubr.msk.f32.vlgmr.msra.gmra.mrb[0].mxu1 %vm191_vm2, %v33_v12 }
  0x99   :  { %v350_v13 = vpop.permute.xlu0 %349 }
  0xf1   :  { %v270_v14 = vpop.f32.mrb[0].mxu0 }
  0xf2   :  { %v341_v15 = vpop.f32.mrb[0].mxu1  ;;  %v352_v16 = vadd.f32 %v350_v13, %v270_v14  ;;  %v272_v18 = vpop.f32.mrb[1].mxu0 }
  0xf3   :  { %v354_v17 = vadd.f32 %v350_v13, %v341_v15  ;;  %v343_v19 = vpop.f32.mrb[1].mxu1  ;;  %v353_v20 = vadd.f32 %v350_v13, %v272_v18 }
  0xf4   :  { %v355_v21 = vadd.f32 %v350_v13, %v343_v19  ;;  %356 = vst [vmem:[#allocation5] sm:$0xff] %v352_v16 }
  0xf5   :  { %358 = vst [vmem:[#allocation5 + $0x10] sm:$0xff] %v354_v17  ;;  %357 = vst [vmem:[#allocation5 + $0x8] sm:$0xff] %v353_v20 }
  0xf6   :  { %359 = vst [vmem:[#allocation5 + $0x18] sm:$0xff] %v355_v21 }
  0xf7   :  { %427 = shalt.err (!%p424_p12)
}
  0xf8   :  { %s428_s15 = scalar_lea.hbm %s520_s5, 512 }
  0xf9   :  { %p429_p13 = scmp.ne.s32.totalorder %s520_s5, %s428_s15  ;;  %p432_p0 = scmp.lt.u32.totalorder %s428_s15, %s520_s5 }
  0xfb   :  { %p434_p1 = pnand %p432_p0, %p429_p13 }
  0xfd   :  { %437 = shalt.err (!%p434_p1)
}
  0xfe   :  { %369 = dma.vmem_to_hbm [thread:$0]  %s367_s13, 512, %s520_s5, [#allocation4]  }
  0xff   :  { %440 = dma.done.wait [#allocation4], 512  }
 0x100   :  { %441 = vsyncadd [#allocation4], 4294966784 }
 0x101   :  { %373 = vsyncpa [#allocation3], 1 }
 0x102   :  { %374 = vsyncpa [#allocation4], 1 }

</bundles_post_ra>
